<compile_context>
chip_gen: v7x
topology: tpu7x:2x2x1
jax: 0.10.0
libtpu: 0.0.40
codegen_flags: <defaults>
</compile_context>

<pallas_src>
import functools

import jax
import jax.numpy as jnp
from jax.experimental import pallas as pl
from jax.experimental.pallas import tpu as pltpu

LANES = 128


def _round_up(x, m):
    return ((x + m - 1) // m) * m


def _focal_partial_kernel(x_ref, t_ref, o_ref, *, gamma, eps, rows, tm):
    """Per-block UNNEGATED focal-loss partial sum -> (1, 8, 128) f32 block."""
    pid = pl.program_id(0)

    x = jnp.clip(x_ref[...].astype(jnp.float32), eps, 1.0 - eps)
    t = t_ref[...].astype(jnp.float32)
    one_m_x = 1.0 - x

    log_x = jnp.log(x)
    log_1mx = jnp.log(one_m_x)

    # gamma is a compile-time constant: integer gamma (the default gamma=2) uses
    # pure VPU multiplies; otherwise reuse the logs already needed (exp(g*log)).
    if float(gamma).is_integer():
        g = int(gamma)
        pow_1mx = jax.lax.integer_pow(one_m_x, g)
        pow_x = jax.lax.integer_pow(x, g)
    else:
        pow_1mx = jnp.exp(gamma * log_1mx)
        pow_x = jnp.exp(gamma * log_x)

    # t*a + (1-t)*b  ==  b + t*(a - b): saves the (1-t) subtract and a multiply.
    a = pow_1mx * log_x
    b = pow_x * log_1mx
    loss = b + t * (a - b)          # unnegated; sign applied once in the wrapper

    def rowsum(l):
        # (tm, 128) -> (tm//8, 8, 128), sum over the leading (non-minor) axis:
        # pure vreg adds on the VPU, no cross-lane XLU work, no MXU.
        return jnp.sum(l.reshape(tm // 8, 8, LANES), axis=0)

    is_last = pid == pl.num_programs(0) - 1

    @pl.when(jnp.logical_not(is_last))
    def _():
        o_ref[...] = rowsum(loss)[None]

    @pl.when(is_last)
    def _():
        # Only the (possibly ragged) last block needs masking. OOB rows of the
        # block contain garbage; the select (not multiply-by-mask) drops any
        # NaN/Inf it may produce.
        row = jax.lax.broadcasted_iota(jnp.int32, (tm, LANES), 0)
        valid = (pid * tm + row) < rows
        o_ref[...] = rowsum(jnp.where(valid, loss, 0.0))[None]


def _focal_unnegated(x, t, gamma, eps):
    x = jnp.clip(x.astype(jnp.float32), eps, 1.0 - eps)
    t = t.astype(jnp.float32)
    return (t * (1.0 - x) ** gamma * jnp.log(x)
            + (1.0 - t) * x ** gamma * jnp.log(1.0 - x))


def focal_loss(inp, target, gamma=2, eps=1e-3, tm=8192):
    assert inp.shape == target.shape
    n_total = inp.size

    # Free (layout-preserving) flatten; no pad/concat copies, no forced upcast
    # of `target` in the wrapper (kernel upcasts in VMEM).
    x_flat = inp.reshape(-1)
    t_flat = target.reshape(-1)

    rows = n_total // LANES
    n_bulk = rows * LANES

    total = jnp.float32(0.0)

    if rows > 0:
        # Sublane multiple required by the input dtypes' packing
        # (f32: 8, bf16: 16, 8-bit: 32).
        def _sub(dt):
            return {4: 8, 2: 16, 1: 32}.get(jnp.dtype(dt).itemsize, 8)

        sub = max(_sub(inp.dtype), _sub(target.dtype))
        tm_eff = min(_round_up(tm, sub), _round_up(rows, sub))
        n_blocks = pl.cdiv(rows, tm_eff)

        x2d = x_flat[:n_bulk].reshape(rows, LANES)
        t2d = t_flat[:n_bulk].reshape(rows, LANES)

        kernel = functools.partial(
            _focal_partial_kernel,
            gamma=float(gamma), eps=float(eps), rows=rows, tm=tm_eff)

        # Explicit scoped-VMEM budget: 2 inputs x 2 buffers (4 tiles) plus up to
        # ~6 materialized f32 temporaries (log_x, log_1mx, pow_x, pow_1mx, a/b,
        # loss) of one tile each, plus slack; capped at 48 MiB for >=25%
        # headroom under v7x's 64 MiB physical VMEM.
        tile_bytes = tm_eff * LANES * 4
        vmem_limit = int(min(max(10 * tile_bytes + (1 << 20), 16 << 20), 48 << 20))

        partials = pl.pallas_call(
            kernel,
            out_shape=jax.ShapeDtypeStruct((n_blocks, 8, LANES), jnp.float32),
            grid_spec=pltpu.PrefetchScalarGridSpec(
                num_scalar_prefetch=0,
                grid=(n_blocks,),
                in_specs=[
                    pl.BlockSpec((tm_eff, LANES), lambda i: (i, 0)),
                    pl.BlockSpec((tm_eff, LANES), lambda i: (i, 0)),
                ],
                out_specs=pl.BlockSpec((1, 8, LANES), lambda i: (i, 0, 0)),
            ),
            compiler_params=pltpu.CompilerParams(
                # Every grid step is independent -> megacore can shard blocks
                # across both TensorCores on v7x; harmless on single-TC chips.
                dimension_semantics=("parallel",),
                vmem_limit_bytes=vmem_limit),
        )(x2d, t2d)

        # Tiny (n_blocks, 8, 128) reduce off the hot path. f32 is accurate to a
        # few ULPs even for large N; use float64 here (with x64 enabled) if
        # bit-level parity with a float64 reference is ever required.
        total = total + jnp.sum(partials)

    if n_bulk < n_total:
        # Tiny ragged tail (< 128 elements): handled in plain JAX.
        total = total + jnp.sum(
            _focal_unnegated(x_flat[n_bulk:], t_flat[n_bulk:], gamma, eps))

    # Single negate + divide on the final scalar (kernel accumulates unnegated).
    return -(total / jnp.float32(n_total))


def focal_loss_ref(inp, target, gamma=2, eps=1e-3):
    x = jnp.clip(inp.astype(jnp.float32), eps, 1.0 - eps)
    t = target.astype(jnp.float32)
    loss = -(t * (1.0 - x) ** gamma * jnp.log(x)
             + (1.0 - t) * x ** gamma * jnp.log(1.0 - x))
    return loss.mean()


if __name__ == "__main__":
    key = jax.random.PRNGKey(0)
    k1, k2 = jax.random.split(key)
    B, C, H, W = 2, 4, 16, 16            # NCHW, matching the PyTorch convention
    # `input` is expected to be probabilities (module clamps to [eps, 1-eps]).
    inp = jax.random.uniform(k1, (B, C, H, W), jnp.float32)
    target = (jax.random.uniform(k2, (B, C, H, W), jnp.float32) > 0.5).astype(jnp.float32)

    out = focal_loss(inp, target, gamma=2)
    out = jax.block_until_ready(out)

    ref = focal_loss_ref(inp, target, gamma=2)
    assert jnp.allclose(out, ref, rtol=1e-5, atol=1e-5), (out, ref)
    print("KERNEL_OK")
</pallas_src>

<mosaic_0001>
module attributes {stable_mosaic.version = 11 : i64} {
  func.func @_focal_partial_kernel(%arg0: i32, %arg1: memref<16x128xf32, #tpu.memory_space<vmem>>, %arg2: memref<16x128xf32, #tpu.memory_space<vmem>>, %arg3: memref<1x8x128xf32, #tpu.memory_space<vmem>>) attributes {dimension_semantics = [#tpu.dimension_semantics<parallel>], iteration_bounds = array<i64: 1>, scalar_prefetch = 0 : i64, scratch_operands = 0 : i64, tpu.core_type = #tpu.core_type<tc>, window_params = [{transform_indices = @transform_0, window_bounds = array<i64: 16, 128>}, {transform_indices = @transform_1, window_bounds = array<i64: 16, 128>}, {transform_indices = @transform_2, window_bounds = array<i64: 1, 8, 128>}]} {
    %c0 = arith.constant 0 : index
    %c0_0 = arith.constant 0 : index
    %0 = vector.load %arg1[%c0, %c0_0] : memref<16x128xf32, #tpu.memory_space<vmem>>, vector<16x128xf32>
    %cst = arith.constant 1.000000e-03 : f32
    %cst_1 = arith.constant 9.990000e-01 : f32
    %1 = vector.broadcast %cst : f32 to vector<16x128xf32>
    %2 = arith.maximumf %1, %0 : vector<16x128xf32>
    %3 = vector.broadcast %cst_1 : f32 to vector<16x128xf32>
    %4 = arith.minimumf %3, %2 : vector<16x128xf32>
    %c0_2 = arith.constant 0 : index
    %c0_3 = arith.constant 0 : index
    %5 = vector.load %arg2[%c0_2, %c0_3] : memref<16x128xf32, #tpu.memory_space<vmem>>, vector<16x128xf32>
    %cst_4 = arith.constant 1.000000e+00 : f32
    %6 = vector.broadcast %cst_4 : f32 to vector<16x128xf32>
    %7 = arith.subf %6, %4 : vector<16x128xf32>
    %8 = math.log %4 : vector<16x128xf32>
    %9 = math.log %7 : vector<16x128xf32>
    %10 = arith.mulf %7, %7 : vector<16x128xf32>
    %11 = arith.mulf %4, %4 : vector<16x128xf32>
    %12 = arith.mulf %10, %8 : vector<16x128xf32>
    %13 = arith.mulf %11, %9 : vector<16x128xf32>
    %14 = arith.subf %12, %13 : vector<16x128xf32>
    %15 = arith.mulf %5, %14 : vector<16x128xf32>
    %16 = arith.addf %13, %15 : vector<16x128xf32>
    %c0_i32 = arith.constant 0 : i32
    %17 = arith.cmpi eq, %arg0, %c0_i32 : i32
    %true = arith.constant true
    %18 = arith.xori %17, %true : i1
    %19 = arith.extui %18 : i1 to i32
    %c0_i32_5 = arith.constant 0 : i32
    %20 = arith.cmpi ne, %19, %c0_i32_5 : i32
    scf.if %20 {
      %23 = vector.shape_cast %16 : vector<16x128xf32> to vector<2x8x128xf32>
      %cst_7 = arith.constant dense<0.000000e+00> : vector<8x128xf32>
      %24 = vector.multi_reduction <add>, %23, %cst_7 [0] : vector<2x8x128xf32> to vector<8x128xf32>
      %25 = vector.shape_cast %24 : vector<8x128xf32> to vector<1x8x128xf32>
      %c0_8 = arith.constant 0 : index
      %c0_9 = arith.constant 0 : index
      %c0_10 = arith.constant 0 : index
      %26 = vector.load %arg3[%c0_8, %c0_9, %c0_10] : memref<1x8x128xf32, #tpu.memory_space<vmem>>, vector<1x8x128xf32>
      tpu.vector_store %arg3[%c0_8, %c0_9, %c0_10], %25 {strides = array<i32>} : memref<1x8x128xf32, #tpu.memory_space<vmem>>, vector<1x8x128xf32>,
    } else {
    }
    %21 = arith.extui %17 : i1 to i32
    %c0_i32_6 = arith.constant 0 : i32
    %22 = arith.cmpi ne, %21, %c0_i32_6 : i32
    scf.if %22 {
      %23 = tpu.iota {dimensions = array<i32: 0>} : vector<16x128xi32>
      %c16_i32 = arith.constant 16 : i32
      %24 = arith.muli %arg0, %c16_i32 : i32
      %25 = vector.broadcast %24 : i32 to vector<16x128xi32>
      %26 = arith.addi %25, %23 : vector<16x128xi32>
      %c16_i32_7 = arith.constant 16 : i32
      %27 = vector.broadcast %c16_i32_7 : i32 to vector<16x128xi32>
      %28 = arith.cmpi slt, %26, %27 : vector<16x128xi32>
      %cst_8 = arith.constant 0.000000e+00 : f32
      %29 = vector.broadcast %cst_8 : f32 to vector<16x128xf32>
      %30 = arith.select %28, %16, %29 : vector<16x128xi1>, vector<16x128xf32>
      %31 = vector.shape_cast %30 : vector<16x128xf32> to vector<2x8x128xf32>
      %cst_9 = arith.constant dense<0.000000e+00> : vector<8x128xf32>
      %32 = vector.multi_reduction <add>, %31, %cst_9 [0] : vector<2x8x128xf32> to vector<8x128xf32>
      %33 = vector.shape_cast %32 : vector<8x128xf32> to vector<1x8x128xf32>
      %c0_10 = arith.constant 0 : index
      %c0_11 = arith.constant 0 : index
      %c0_12 = arith.constant 0 : index
      %34 = vector.load %arg3[%c0_10, %c0_11, %c0_12] : memref<1x8x128xf32, #tpu.memory_space<vmem>>, vector<1x8x128xf32>
      tpu.vector_store %arg3[%c0_10, %c0_11, %c0_12], %33 {strides = array<i32>} : memref<1x8x128xf32, #tpu.memory_space<vmem>>, vector<1x8x128xf32>,
    } else {
    }
    return
  }
  func.func @transform_0(%arg0: i32) -> (i32, i32) {
    %c0_i32 = arith.constant 0 : i32
    %c0_i32_0 = arith.constant 0 : i32
    return %arg0, %c0_i32 : i32, i32
  }
  func.func @transform_1(%arg0: i32) -> (i32, i32) {
    %c0_i32 = arith.constant 0 : i32
    %c0_i32_0 = arith.constant 0 : i32
    return %arg0, %c0_i32 : i32, i32
  }
  func.func @transform_2(%arg0: i32) -> (i32, i32, i32) {
    %c0_i32 = arith.constant 0 : i32
    %c0_i32_0 = arith.constant 0 : i32
    %c0_i32_1 = arith.constant 0 : i32
    return %arg0, %c0_i32, %c0_i32_0 : i32, i32, i32
  }
}

</mosaic_0001>

<bundles_post_ra>
// kernel: tpu_custom_call.1
= control target key start
LH: loop header
LB: loop body
LE: loop exit
PB: predicated region body
PF: predicated region fallthrough
CT: control target
= control target key end

     0   :  { %7 = vsyncpa [#allocation3], 0  ;;  %s252_s0 = inlined_call_operand.hbm [shape: f32[16,128], index: 0, kind: input, shape index: {}]   ;;  %s253_s1 = inlined_call_operand.hbm [shape: f32[16,128], index: 1, kind: input, shape index: {}]   ;;  %s254_s2 = inlined_call_operand.hbm [shape: f32[1,8,128], index: 2, kind: output, shape index: {}]  }
   0x1   :  { %8 = vsyncpa [#allocation6], 0 }
   0x2   :  { %9 = vsyncpa [#allocation4], 0  ;;  %s196_s9 = smov [#allocation2]   ;;  %s124_s13 = scalar_lea.hbm %s252_s0, 256 }
   0x3   :  { %s15_s10 = sshll.u32 %s196_s9, 4  ;;  %p125_p0 = scmp.ne.s32.totalorder %s252_s0, %s124_s13  ;;  %s16_s10 = int_to_ptr.vmem [resolvable:$true] %s15_s10 }
   0x4   :  { %p128_p1 = scmp.lt.u32.totalorder %s124_s13, %s252_s0 }
   0x6   :  { %p130_p2 = pnand %p128_p1, %p125_p0 }
   0x8   :  { %133 = shalt.err (!%p130_p2)
}
   0x9   :  { %s134_s18 = scalar_lea.vmem %s16_s10, 256  ;;  %p139_p4 = scmp.lt.s32.totalorder %s16_s10, %s16_s10 }
   0xa   :  { %p135_p3 = scmp.ne.s32.totalorder %s16_s10, %s134_s18  ;;  %p140_p5 = scmp.lt.s32.totalorder %s134_s18, %s134_s18 }
   0xc   :  { %p141_p6 = por %p140_p5, %p139_p4 }
   0xe   :  { %p142_p7 = pnand %p141_p6, %p135_p3 }
  0x10   :  { %145 = shalt.err (!%p142_p7)
}
  0x11   :  { %s197_s19 = smov 128   ;;  %s198_s20 = smov 8  }
  0x12   :  { %21 = dma.hbm_to_vmem [thread:$0]  %s252_s0, 256, %s16_s10, [#allocation3], %s197_s19, %s197_s19, %s198_s20  }
  0x13   :  { %s199_s23 = smov [#allocation5]   ;;  %s146_s27 = scalar_lea.hbm %s253_s1, 256 }
  0x14   :  { %s27_s24 = sshll.u32 %s199_s23, 4  ;;  %p147_p8 = scmp.ne.s32.totalorder %s253_s1, %s146_s27  ;;  %s28_s24 = int_to_ptr.vmem [resolvable:$true] %s27_s24 }
  0x15   :  { %p150_p9 = scmp.lt.u32.totalorder %s146_s27, %s253_s1 }
  0x17   :  { %p152_p10 = pnand %p150_p9, %p147_p8 }
  0x19   :  { %155 = shalt.err (!%p152_p10)
}
  0x1a   :  { %s156_s4 = scalar_lea.vmem %s28_s24, 256  ;;  %p161_p12 = scmp.lt.s32.totalorder %s28_s24, %s28_s24 }
  0x1b   :  { %p157_p11 = scmp.ne.s32.totalorder %s28_s24, %s156_s4  ;;  %p162_p13 = scmp.lt.s32.totalorder %s156_s4, %s156_s4 }
  0x1d   :  { %p163_p0 = por %p162_p13, %p161_p12 }
  0x1f   :  { %p164_p1 = pnand %p163_p0, %p157_p11 }
  0x21   :  { %167 = shalt.err (!%p164_p1)
}
  0x22   :  { %33 = dma.hbm_to_vmem [thread:$0]  %s253_s1, 256, %s28_s24, [#allocation6], %s197_s19, %s197_s19, %s198_s20  }
  0x23   :  { %190 = dma.done.wait [#allocation3], 256  }
  0x24   :  { %191 = vsyncadd [#allocation3], 4294967040 }
  0x25   :  { %192 = dma.done.wait [#allocation6], 256  }
  0x26   :  { %193 = vsyncadd [#allocation6], 4294967040  ;;  %v40_v0 = vld [vmem:[#allocation2] sm:$0xff]  ;;  %v41_v1 = vld [vmem:[#allocation2 + $0x8] sm:$0xff]  ;;  %s200_s1 = smov [#allocation7]  }
  0x27   :  { %v42_v2 = vmax.f32 %v40_v0, 0.001  ;;  %v43_v3 = vmax.f32 %v41_v1, 0.001  ;;  %v46_v23 = vld [vmem:[#allocation5] sm:$0xff]  ;;  %v47_v25 = vld [vmem:[#allocation5 + $0x8] sm:$0xff] }
  0x28   :  { %s101_s6 = sshll.u32 %s200_s1, 4  ;;  %s102_s6 = int_to_ptr.vmem [resolvable:$true] %s101_s6 }
  0x29   :  { %v44_v4 = vmin.f32 %v42_v2, 0.999  ;;  %v45_v5 = vmin.f32 %v43_v3, 0.999  ;;  %s168_s7 = scalar_lea.vmem %s102_s6, 128  ;;  %p173_p3 = scmp.lt.s32.totalorder %s102_s6, %s102_s6 }
  0x2a   :  { %p169_p2 = scmp.ne.s32.totalorder %s102_s6, %s168_s7  ;;  %p174_p4 = scmp.lt.s32.totalorder %s168_s7, %s168_s7 }
  0x2b   :  { %v48_v6 = vsub.f32 1.0, %v44_v4  ;;  %v49_v7 = vsub.f32 1.0, %v45_v5  ;;  %116 = vlog2.f32 %v44_v4  ;;  %v60_v13 = vmul.f32 %v44_v4, %v44_v4 }
  0x2c   :  { %118 = vlog2.f32 %v45_v5  ;;  %v61_v16 = vmul.f32 %v45_v5, %v45_v5  ;;  %p175_p5 = por %p174_p4, %p173_p3 }
  0x2d   :  { %120 = vlog2.f32 %v48_v6  ;;  %v58_v8 = vmul.f32 %v48_v6, %v48_v6  ;;  %v59_v10 = vmul.f32 %v49_v7, %v49_v7 }
  0x2e   :  { %122 = vlog2.f32 %v49_v7  ;;  %p176_p6 = pnand %p175_p5, %p169_p2 }
  0x35   :  { %v117_v9 = vpop.eup %116 }
  0x36   :  { %v119_v11 = vpop.eup %118  ;;  %v51_v12 = vmul.f32 0.6931472, %v117_v9 }
  0x37   :  { %v121_v14 = vpop.eup %120  ;;  %v53_v15 = vmul.f32 0.6931472, %v119_v11 }
  0x38   :  { %v123_v17 = vpop.eup %122  ;;  %v55_v18 = vmul.f32 0.6931472, %v121_v14  ;;  %v62_v19 = vmul.f32 %v58_v8, %v51_v12 }
  0x39   :  { %v57_v20 = vmul.f32 0.6931472, %v123_v17  ;;  %v63_v21 = vmul.f32 %v59_v10, %v53_v15 }
  0x3a   :  { %v64_v22 = vmul.f32 %v60_v13, %v55_v18 }
  0x3b   :  { %v65_v24 = vmul.f32 %v61_v16, %v57_v20 }
  0x3c   :  { %v66_v26 = vsub.f32 %v62_v19, %v64_v22 }
  0x3d   :  { %v67_v27 = vsub.f32 %v63_v21, %v65_v24 }
  0x3e   :  { %v68_v28 = vmul.f32 %v66_v26, %v46_v23 }
  0x3f   :  { %v69_v29 = vmul.f32 %v67_v27, %v47_v25 }
  0x40   :  { %v70_v30 = vadd.f32 %v68_v28, %v64_v22 }
  0x41   :  { %v71_v31 = vadd.f32 %v69_v29, %v65_v24 }
  0x43   :  { %v93_v32 = vadd.f32 %v71_v31, %v70_v30 }
  0x45   :  { %94 = vst [vmem:[#allocation7] sm:$0xff] %v93_v32 }
  0x46   :  { %179 = shalt.err (!%p176_p6)
}
  0x47   :  { %s180_s10 = scalar_lea.hbm %s254_s2, 128 }
  0x48   :  { %p181_p7 = scmp.ne.s32.totalorder %s254_s2, %s180_s10  ;;  %p184_p8 = scmp.lt.u32.totalorder %s180_s10, %s254_s2 }
  0x4a   :  { %p186_p9 = pnand %p184_p8, %p181_p7 }
  0x4c   :  { %189 = shalt.err (!%p186_p9)
}
  0x4d   :  { %104 = dma.vmem_to_hbm [thread:$0]  %s102_s6, 128, %s254_s2, [#allocation4]  }
  0x4e   :  { %194 = dma.done.wait [#allocation4], 128  }
  0x4f   :  { %195 = vsyncadd [#allocation4], 4294967168 }
  0x50   :  { %108 = vsyncpa [#allocation3], 1 }
  0x51   :  { %109 = vsyncpa [#allocation6], 1 }
  0x52   :  { %110 = vsyncpa [#allocation4], 1 }

</bundles_post_ra>
